<compile_context>
chip_gen: v7x
topology: tpu7x:2x2x1
jax: 0.10.0
libtpu: 0.0.40
codegen_flags: <defaults>
</compile_context>

<pallas_src>
import functools

import jax
import jax.numpy as jnp
import numpy as np
from jax.experimental import pallas as pl
from jax.experimental.pallas import tpu as pltpu

_VMEM_LIMIT = 32 * 1024 * 1024


def _round_up(x, m):
    return ((x + m - 1) // m) * m


def _pick_tile(n, pref):
    # Largest useful tile: the preferred size, clamped to the sublane-aligned row count so
    # tiny problems don't get padded to 256 rows.
    return min(pref, _round_up(max(int(n), 1), 8))


def _pad2d(a, rows, cols, dtype=jnp.float32):
    a = jnp.asarray(a, dtype)
    return jnp.pad(a, ((0, rows - a.shape[0]), (0, cols - a.shape[1])))


# --------------------------------------------------------------------------- #
# Kernel 1: msg = act(x @ W + b) * node_weight, row-tiled ("parallel").
# x and W arrive already in the compute dtype (host pre-cast); f32 accumulation.
# --------------------------------------------------------------------------- #
def _dense_msg_kernel(apply_relu, x_ref, w_ref, b_ref, nw_ref, out_ref):
    acc = jnp.dot(x_ref[...], w_ref[...],
                  preferred_element_type=jnp.float32) + b_ref[...]
    if apply_relu:
        acc = jnp.maximum(acc, 0.0)
    out_ref[...] = (acc * nw_ref[...]).astype(out_ref.dtype)


def _dense_msg(x, w, b, nw, *, apply_relu, out_dtype, row_tile):
    n, hp = x.shape
    in_bytes = (n * hp + hp * hp) * jnp.dtype(x.dtype).itemsize + (hp + n) * 4
    out_bytes = n * hp * jnp.dtype(out_dtype).itemsize
    cost = pl.CostEstimate(flops=int(2 * n * hp * hp + 3 * n * hp),
                           transcendentals=0,
                           bytes_accessed=int(in_bytes + out_bytes))
    kernel = functools.partial(_dense_msg_kernel, bool(apply_relu))
    return pl.pallas_call(
        kernel,
        out_shape=jax.ShapeDtypeStruct((n, hp), out_dtype),
        grid_spec=pltpu.PrefetchScalarGridSpec(
            num_scalar_prefetch=0,
            grid=(n // row_tile,),
            in_specs=[
                pl.BlockSpec((row_tile, hp), lambda i: (i, 0)),   # x rows
                pl.BlockSpec((hp, hp), lambda i: (0, 0)),         # W (grid-invariant)
                pl.BlockSpec((1, hp), lambda i: (0, 0)),          # bias
                pl.BlockSpec((row_tile, 1), lambda i: (i, 0)),    # per-row node weight
            ],
            out_specs=pl.BlockSpec((row_tile, hp), lambda i: (i, 0)),
        ),
        compiler_params=pltpu.CompilerParams(
            dimension_semantics=("parallel",),
            vmem_limit_bytes=_VMEM_LIMIT),
        cost_estimate=cost,
    )(x, w, b, nw)


# --------------------------------------------------------------------------- #
# Kernel 2 (gather): pair_msgs = msg[src_idx] * pair_w.
# Grid = (pair tiles ["parallel"], source tiles ["arbitrary"]).  One-hot gather on the MXU,
# accumulated across source tiles in an f32 VMEM scratch, so msg is never fully resident.
# --------------------------------------------------------------------------- #
def _gather_kernel(compute_dtype, src_idx_ref, pair_w_ref, msg_ref, out_ref, acc_ref):
    s = pl.program_id(1)
    tp = out_ref.shape[0]
    ts = msg_ref.shape[0]

    @pl.when(s == 0)
    def _init():
        acc_ref[...] = jnp.zeros_like(acc_ref)

    base = s * ts
    gsel = (jax.lax.broadcasted_iota(jnp.int32, (tp, ts), 1) + base
            == src_idx_ref[...]).astype(compute_dtype)
    acc_ref[...] += jnp.dot(gsel, msg_ref[...], preferred_element_type=jnp.float32)

    @pl.when(s == pl.num_programs(1) - 1)
    def _finalize():
        # pair_w applied exactly once; padded pairs (idx 0, weight 0) contribute zero.
        out_ref[...] = (acc_ref[...] * pair_w_ref[...]).astype(out_ref.dtype)


def _pair_gather(msg, src_idx, pair_w, *, compute_dtype, pair_tile, src_tile):
    n_src, hp = msg.shape
    pp = src_idx.shape[0]
    grid = (pp // pair_tile, n_src // src_tile)
    msg_bytes = grid[0] * n_src * hp * jnp.dtype(msg.dtype).itemsize
    cost = pl.CostEstimate(
        flops=int(2 * pp * n_src * hp),
        transcendentals=0,
        bytes_accessed=int(msg_bytes + pp * 8
                           + pp * hp * jnp.dtype(compute_dtype).itemsize))
    kernel = functools.partial(_gather_kernel, compute_dtype)
    return pl.pallas_call(
        kernel,
        out_shape=jax.ShapeDtypeStruct((pp, hp), compute_dtype),
        grid_spec=pltpu.PrefetchScalarGridSpec(
            num_scalar_prefetch=0,
            grid=grid,
            in_specs=[
                pl.BlockSpec((pair_tile, 1), lambda q, s: (q, 0)),   # src indices
                pl.BlockSpec((pair_tile, 1), lambda q, s: (q, 0)),   # per-pair reg weight
                pl.BlockSpec((src_tile, hp), lambda q, s: (s, 0)),   # msg source tile
            ],
            out_specs=pl.BlockSpec((pair_tile, hp), lambda q, s: (q, 0)),
            scratch_shapes=[pltpu.VMEM((pair_tile, hp), jnp.float32)],
        ),
        compiler_params=pltpu.CompilerParams(
            dimension_semantics=("parallel", "arbitrary"),
            vmem_limit_bytes=_VMEM_LIMIT),
        cost_estimate=cost,
    )(src_idx, pair_w, msg)


# --------------------------------------------------------------------------- #
# Kernel 3 (scatter): out = (base * base_w * base_fac + seg_sum(pair_msgs, dst_idx)) * inv_sum.
# Grid = (dst row tiles ["parallel"], pair tiles ["arbitrary"]).  No msg-resident block.
# --------------------------------------------------------------------------- #
def _scatter_kernel(base_fac, compute_dtype, dst_idx_ref, pair_ref, base_ref,
                    base_w_ref, inv_sum_ref, out_ref, acc_ref):
    r = pl.program_id(0)
    p = pl.program_id(1)
    tr = out_ref.shape[0]
    tp = pair_ref.shape[0]

    @pl.when(p == 0)
    def _init():
        acc_ref[...] = jnp.zeros_like(acc_ref)

    row0 = r * tr
    ssel = (jax.lax.broadcasted_iota(jnp.int32, (tp, tr), 1) + row0
            == dst_idx_ref[...]).astype(compute_dtype)
    # Contract over the pair axis so the transposed (tr, tp) one-hot is never materialized.
    acc_ref[...] += jax.lax.dot_general(
        ssel, pair_ref[...],
        dimension_numbers=(((0,), (0,)), ((), ())),
        preferred_element_type=jnp.float32)

    @pl.when(p == pl.num_programs(1) - 1)
    def _finalize():
        out_ref[...] = ((base_ref[...] * base_w_ref[...] * base_fac)
                        + acc_ref[...]) * inv_sum_ref[...]


def _scatter_add(pair_msgs, dst_idx, base, base_w, inv_sum, *,
                 base_fac, compute_dtype, row_tile, pair_tile):
    pp, hp = pair_msgs.shape
    n_dst = base.shape[0]
    grid = (n_dst // row_tile, pp // pair_tile)
    pair_bytes = grid[0] * pp * (hp * jnp.dtype(compute_dtype).itemsize + 4)
    cost = pl.CostEstimate(
        flops=int(2 * pp * n_dst * hp + 4 * n_dst * hp),
        transcendentals=0,
        bytes_accessed=int(pair_bytes + n_dst * (hp + 2) * 4 + n_dst * hp * 4))
    kernel = functools.partial(_scatter_kernel, float(base_fac), compute_dtype)
    return pl.pallas_call(
        kernel,
        out_shape=jax.ShapeDtypeStruct((n_dst, hp), jnp.float32),
        grid_spec=pltpu.PrefetchScalarGridSpec(
            num_scalar_prefetch=0,
            grid=grid,
            in_specs=[
                pl.BlockSpec((pair_tile, 1), lambda r, p: (p, 0)),   # dst indices
                pl.BlockSpec((pair_tile, hp), lambda r, p: (p, 0)),  # gathered pair msgs
                pl.BlockSpec((row_tile, hp), lambda r, p: (r, 0)),   # base rows
                pl.BlockSpec((row_tile, 1), lambda r, p: (r, 0)),    # base node weight
                pl.BlockSpec((row_tile, 1), lambda r, p: (r, 0)),    # 1 / reg_sum
            ],
            out_specs=pl.BlockSpec((row_tile, hp), lambda r, p: (r, 0)),
            scratch_shapes=[pltpu.VMEM((row_tile, hp), jnp.float32)],
        ),
        compiler_params=pltpu.CompilerParams(
            dimension_semantics=("parallel", "arbitrary"),
            vmem_limit_bytes=_VMEM_LIMIT),
        cost_estimate=cost,
    )(dst_idx, pair_msgs, base, base_w, inv_sum)


# --------------------------------------------------------------------------- #
# Forward wrapper
# --------------------------------------------------------------------------- #
def hypermod_forward(v, e, player_idx, game_idx, params, *,
                     v_fac=1.0, edge_linear=False,
                     compute_dtype=jnp.float32,
                     row_tile=256, pair_tile=256):
    """Non-last HyperMod forward: returns (v_new, e_new)."""
    nv, H = v.shape
    ne = e.shape[0]
    P = player_idx.shape[0]
    f32 = jnp.float32
    cdt = compute_dtype
    is_f32 = jnp.dtype(cdt) == jnp.dtype(f32)

    hp = _round_up(H, 128)                       # lane-dense hidden dim
    v_tile = _pick_tile(nv, row_tile)
    e_tile = _pick_tile(ne, row_tile)
    p_tile = _pick_tile(P, pair_tile)
    nvp = _round_up(nv, v_tile)
    nep = _round_up(ne, e_tile)
    pp = _round_up(P, p_tile)

    # Big matmul operands host-cast to the compute dtype (halves DMA bytes in bf16 mode).
    v_p = _pad2d(v, nvp, hp, cdt)
    e_p = _pad2d(e, nep, hp, cdt)
    w_v2e = _pad2d(params["W_v2e"], hp, hp, cdt)
    w_e2v = _pad2d(params["W_e2v"], hp, hp, cdt)
    b_v = _pad2d(jnp.reshape(params["b_v"], (1, H)), 1, hp, f32)
    b_e = _pad2d(jnp.reshape(params["b_e"], (1, H)), 1, hp, f32)
    v_w = _pad2d(params["v_weight"], nvp, 1, f32)
    e_w = _pad2d(params["e_weight"], nep, 1, f32)
    ones_e = jnp.ones((nep, 1), f32)

    # Epilogue base terms stay f32 regardless of the MXU compute dtype.
    v_base = v_p if is_f32 else _pad2d(v, nvp, hp, f32)
    e_base = e_p if is_f32 else _pad2d(e, nep, hp, f32)

    # Reciprocals computed BEFORE zero padding: padded rows multiply by 0, never by inf.
    inv_v_sum = _pad2d(1.0 / jnp.asarray(params["v_reg_sum"], f32), nvp, 1, f32)
    inv_e_sum = _pad2d(1.0 / jnp.asarray(params["e_reg_sum"], f32), nep, 1, f32)

    # Padded pairs get reg weight 0 and index 0 -> contribute exactly zero.
    v_reg_w = _pad2d(params["v_reg_w_pairs"], pp, 1, f32)
    e_reg_w = _pad2d(params["e_reg_w_pairs"], pp, 1, f32)
    pidx = jnp.pad(player_idx.astype(jnp.int32), (0, pp - P)).reshape(pp, 1)
    gidx = jnp.pad(game_idx.astype(jnp.int32), (0, pp - P)).reshape(pp, 1)

    # Phase 1: vertex -> edge.
    msg_v = _dense_msg(v_p, w_v2e, b_v, v_w, apply_relu=not edge_linear,
                       out_dtype=cdt, row_tile=v_tile)
    pair_ve = _pair_gather(msg_v, pidx, v_reg_w, compute_dtype=cdt,
                           pair_tile=p_tile, src_tile=v_tile)
    e_new_p = _scatter_add(pair_ve, gidx, e_base, ones_e, inv_e_sum,
                           base_fac=1.0, compute_dtype=cdt,
                           row_tile=e_tile, pair_tile=p_tile)

    # Phase 2: edge -> vertex.
    e_in = e_new_p if is_f32 else e_new_p.astype(cdt)
    msg_e = _dense_msg(e_in, w_e2v, b_e, e_w, apply_relu=True,
                       out_dtype=cdt, row_tile=e_tile)
    pair_ev = _pair_gather(msg_e, gidx, e_reg_w, compute_dtype=cdt,
                           pair_tile=p_tile, src_tile=e_tile)
    v_new_p = _scatter_add(pair_ev, pidx, v_base, v_w, inv_v_sum,
                           base_fac=v_fac, compute_dtype=cdt,
                           row_tile=v_tile, pair_tile=p_tile)

    return v_new_p[:nv, :H], e_new_p[:ne, :H]


# --------------------------------------------------------------------------- #
# Pure-JAX reference mirroring the PyTorch forward
# --------------------------------------------------------------------------- #
def hypermod_reference(v, e, player_idx, game_idx, params, *,
                       v_fac=1.0, edge_linear=False):
    nv = v.shape[0]
    ne = e.shape[0]
    ve = v @ params["W_v2e"] + params["b_v"]
    if not edge_linear:
        ve = jax.nn.relu(ve)
    v_scaled = v * params["v_weight"] * v_fac
    pair_ve = (ve * params["v_weight"])[player_idx] * params["v_reg_w_pairs"]
    e_new = e + jax.ops.segment_sum(pair_ve, game_idx, num_segments=ne)
    e_new = e_new / params["e_reg_sum"]
    ev = jax.nn.relu(e_new @ params["W_e2v"] + params["b_e"])
    pair_ev = (ev * params["e_weight"])[game_idx] * params["e_reg_w_pairs"]
    v_new = v_scaled + jax.ops.segment_sum(pair_ev, player_idx, num_segments=nv)
    v_new = v_new / params["v_reg_sum"]
    return v_new, e_new


if __name__ == "__main__":
    nv, ne, H, P = 16, 8, 32, 24          # vertices (players), edges (games), hidden, pairs

    key = jax.random.PRNGKey(0)
    ks = jax.random.split(key, 12)

    v = jax.random.normal(ks[0], (nv, H), dtype=jnp.float32)
    e = jax.random.normal(ks[1], (ne, H), dtype=jnp.float32)
    player_idx = jax.random.randint(ks[2], (P,), 0, nv, dtype=jnp.int32)
    game_idx = jax.random.randint(ks[3], (P,), 0, ne, dtype=jnp.int32)
    idx = jnp.arange(P, dtype=jnp.int32)   # selects rows of v_reg_weight / e_reg_weight

    params = {
        "W_v2e": jax.random.normal(ks[4], (H, H), dtype=jnp.float32),
        "W_e2v": jax.random.normal(ks[5], (H, H), dtype=jnp.float32),
        "b_v": jnp.zeros((1, H), dtype=jnp.float32),
        "b_e": jnp.zeros((1, H), dtype=jnp.float32),
        "v_weight": jax.random.uniform(ks[6], (nv, 1), minval=0.5, maxval=1.5),
        "e_weight": jax.random.uniform(ks[7], (ne, 1), minval=0.5, maxval=1.5),
        "v_reg_sum": jax.random.uniform(ks[8], (nv, 1), minval=1.0, maxval=2.0),
        "e_reg_sum": jax.random.uniform(ks[9], (ne, 1), minval=1.0, maxval=2.0),
        "v_reg_w_pairs": jax.random.uniform(ks[10], (P, 1), minval=0.5, maxval=1.5)[idx],
        "e_reg_w_pairs": jax.random.uniform(ks[11], (P, 1), minval=0.5, maxval=1.5)[idx],
    }

    v_ref, e_ref = hypermod_reference(v, e, player_idx, game_idx, params,
                                      v_fac=1.0, edge_linear=False)
    v_ref, e_ref = np.asarray(v_ref), np.asarray(e_ref)

    def _scaled_max_err(a, b):
        a, b = np.asarray(a, np.float32), np.asarray(b, np.float32)
        return float(np.max(np.abs(a - b)) / (np.max(np.abs(b)) + 1e-6))

    # --- f32 MXU path (tolerance allows for TPU default-precision matmul in the reference)
    v_out, e_out = hypermod_forward(v, e, player_idx, game_idx, params,
                                    v_fac=1.0, edge_linear=False,
                                    compute_dtype=jnp.float32)
    jax.block_until_ready((v_out, e_out))
    assert v_out.shape == (nv, H) and e_out.shape == (ne, H)
    assert _scaled_max_err(v_out, v_ref) < 3e-2
    assert _scaled_max_err(e_out, e_ref) < 3e-2

    # --- bf16 MXU path (host bf16 pre-cast operands, f32 accumulation): loose check
    v_bf, e_bf = hypermod_forward(v, e, player_idx, game_idx, params,
                                  v_fac=1.0, edge_linear=False,
                                  compute_dtype=jnp.bfloat16)
    jax.block_until_ready((v_bf, e_bf))
    assert _scaled_max_err(v_bf, v_ref) < 1e-1
    assert _scaled_max_err(e_bf, e_ref) < 1e-1

    print("KERNEL_OK")
</pallas_src>

<mosaic_0001>
module attributes {stable_mosaic.version = 11 : i64} {
  func.func @_dense_msg_kernel(%arg0: i32, %arg1: memref<16x128xf32, #tpu.memory_space<vmem>>, %arg2: memref<128x128xf32, #tpu.memory_space<vmem>>, %arg3: memref<1x128xf32, #tpu.memory_space<vmem>>, %arg4: memref<16x1xf32, #tpu.memory_space<vmem>>, %arg5: memref<16x128xf32, #tpu.memory_space<vmem>>) attributes {dimension_semantics = [#tpu.dimension_semantics<parallel>], iteration_bounds = array<i64: 1>, scalar_prefetch = 0 : i64, scratch_operands = 0 : i64, tpu.core_type = #tpu.core_type<tc>, window_params = [{transform_indices = @transform_0, window_bounds = array<i64: 16, 128>}, {pipeline_mode = #tpu.pipeline_mode<synchronous>, transform_indices = @transform_1, window_bounds = array<i64: 128, 128>}, {pipeline_mode = #tpu.pipeline_mode<synchronous>, transform_indices = @transform_2, window_bounds = array<i64: 1, 128>}, {transform_indices = @transform_3, window_bounds = array<i64: 16, 1>}, {transform_indices = @transform_4, window_bounds = array<i64: 16, 128>}]} {
    %c0 = arith.constant 0 : index
    %c0_0 = arith.constant 0 : index
    %0 = vector.load %arg1[%c0, %c0_0] : memref<16x128xf32, #tpu.memory_space<vmem>>, vector<16x128xf32>
    %c0_1 = arith.constant 0 : index
    %c0_2 = arith.constant 0 : index
    %1 = vector.load %arg2[%c0_1, %c0_2] : memref<128x128xf32, #tpu.memory_space<vmem>>, vector<128x128xf32>
    %cst = arith.constant dense<0.000000e+00> : vector<16x128xf32>
    %2 = tpu.matmul %0, %1, %cst {dimension_numbers = #tpu.dot_dimension_numbers<[1], [0], [0], [1], [0, 0, 1, 1], [], []>} : vector<16x128xf32>, vector<128x128xf32>, vector<16x128xf32> -> vector<16x128xf32>
    %c0_3 = arith.constant 0 : index
    %c0_4 = arith.constant 0 : index
    %3 = vector.load %arg3[%c0_3, %c0_4] : memref<1x128xf32, #tpu.memory_space<vmem>>, vector<1x128xf32>
    %4 = vector.broadcast %3 : vector<1x128xf32> to vector<16x128xf32>
    %5 = arith.addf %2, %4 : vector<16x128xf32>
    %cst_5 = arith.constant 0.000000e+00 : f32
    %6 = vector.broadcast %cst_5 : f32 to vector<16x128xf32>
    %7 = arith.maximumf %5, %6 : vector<16x128xf32>
    %c0_6 = arith.constant 0 : index
    %c0_7 = arith.constant 0 : index
    %8 = vector.load %arg4[%c0_6, %c0_7] : memref<16x1xf32, #tpu.memory_space<vmem>>, vector<16x1xf32>
    %9 = vector.broadcast %8 : vector<16x1xf32> to vector<16x128xf32>
    %10 = arith.mulf %7, %9 : vector<16x128xf32>
    %c0_8 = arith.constant 0 : index
    %c0_9 = arith.constant 0 : index
    %11 = vector.load %arg5[%c0_8, %c0_9] : memref<16x128xf32, #tpu.memory_space<vmem>>, vector<16x128xf32>
    tpu.vector_store %arg5[%c0_8, %c0_9], %10 {strides = array<i32>} : memref<16x128xf32, #tpu.memory_space<vmem>>, vector<16x128xf32>,
    return
  }
  func.func @transform_0(%arg0: i32) -> (i32, i32) {
    %c0_i32 = arith.constant 0 : i32
    %c0_i32_0 = arith.constant 0 : i32
    return %arg0, %c0_i32 : i32, i32
  }
  func.func @transform_1(%arg0: i32) -> (i32, i32) {
    %c0_i32 = arith.constant 0 : i32
    %c0_i32_0 = arith.constant 0 : i32
    %c0_i32_1 = arith.constant 0 : i32
    return %c0_i32, %c0_i32_0 : i32, i32
  }
  func.func @transform_2(%arg0: i32) -> (i32, i32) {
    %c0_i32 = arith.constant 0 : i32
    %c0_i32_0 = arith.constant 0 : i32
    %c0_i32_1 = arith.constant 0 : i32
    return %c0_i32, %c0_i32_0 : i32, i32
  }
  func.func @transform_3(%arg0: i32) -> (i32, i32) {
    %c0_i32 = arith.constant 0 : i32
    %c0_i32_0 = arith.constant 0 : i32
    return %arg0, %c0_i32 : i32, i32
  }
  func.func @transform_4(%arg0: i32) -> (i32, i32) {
    %c0_i32 = arith.constant 0 : i32
    %c0_i32_0 = arith.constant 0 : i32
    return %arg0, %c0_i32 : i32, i32
  }
}

</mosaic_0001>

<bundles_post_ra>
// kernel: tpu_custom_call.1
= control target key start
LH: loop header
LB: loop body
LE: loop exit
PB: predicated region body
PF: predicated region fallthrough
CT: control target
= control target key end

     0   :  { %9 = vsyncpa [#allocation3], 0  ;;  %s382_s0 = inlined_call_operand.vmem [shape: f32[16,128], index: 0, kind: input, shape index: {}]   ;;  %s383_s1 = inlined_call_operand.hbm [shape: f32[128,128], index: 1, kind: input, shape index: {}]   ;;  %s384_s2 = inlined_call_operand.vmem [shape: f32[1,128], index: 2, kind: input, shape index: {}]   ;;  %s385_s3 = inlined_call_operand.vmem [shape: f32[16,1], index: 3, kind: input, shape index: {}]   ;;  %s386_s4 = inlined_call_operand.hbm [shape: f32[16,128], index: 4, kind: output, shape index: {}]  }
   0x1   :  { %10 = vsyncpa [#allocation4], 0  ;;  %s307_s15 = smov [#allocation2]   ;;  %s259_s19 = scalar_lea.hbm %s383_s1, 2048 }
   0x2   :  { %s18_s16 = sshll.u32 %s307_s15, 4  ;;  %p260_p0 = scmp.ne.s32.totalorder %s383_s1, %s259_s19  ;;  %s19_s16 = int_to_ptr.vmem [resolvable:$true] %s18_s16 }
   0x3   :  { %p263_p1 = scmp.lt.u32.totalorder %s259_s19, %s383_s1 }
   0x5   :  { %p265_p2 = pnand %p263_p1, %p260_p0 }
   0x7   :  { %268 = shalt.err (!%p265_p2)
}
   0x8   :  { %s269_s24 = scalar_lea.vmem %s19_s16, 2048  ;;  %p274_p4 = scmp.lt.s32.totalorder %s19_s16, %s19_s16 }
   0x9   :  { %p270_p3 = scmp.ne.s32.totalorder %s19_s16, %s269_s24  ;;  %p275_p5 = scmp.lt.s32.totalorder %s269_s24, %s269_s24 }
   0xb   :  { %p276_p6 = por %p275_p5, %p274_p4 }
   0xd   :  { %p277_p7 = pnand %p276_p6, %p270_p3 }
   0xf   :  { %280 = shalt.err (!%p277_p7)
}
  0x10   :  { %s308_s25 = smov 128   ;;  %s309_s26 = smov 8  }
  0x11   :  { %24 = dma.hbm_to_vmem [thread:$0]  %s383_s1, 2048, %s19_s16, [#allocation3], %s308_s25, %s308_s25, %s309_s26  }
  0x12   :  { %303 = dma.done.wait [#allocation3], 2048  }
  0x13   :  { %304 = vsyncadd [#allocation3], 4294965248  ;;  %v310_v0 = vmov 0   ;;  %v34_v1 = vld [vmem:[#allocation2] sm:$0xff]  ;;  %v35_v2 = vld [vmem:[#allocation2 + $0x8] sm:$0xff]  ;;  %s311_s11 = smov [#allocation5]  }
  0x14   :  { %258 = vset.pattern.permute.xlu0 %v310_v0  ;;  %v36_v3 = vld [vmem:[#allocation2 + $0x10] sm:$0xff]  ;;  %v221_v4 = vpack.c.bf16 %v35_v2, %v34_v1  ;;  %v37_v5 = vld [vmem:[#allocation2 + $0x18] sm:$0xff]  ;;  %v38_v7 = vld [vmem:[#allocation2 + $0x20] sm:$0xff]  ;;  %s155_s12 = sshll.u32 %s311_s11, 4  ;;  %s156_s12 = int_to_ptr.vmem [resolvable:$true] %s155_s12 }
  0x15   :  { %v225_v6 = vpack.c.bf16 %v37_v5, %v36_v3  ;;  %v39_v8 = vld [vmem:[#allocation2 + $0x28] sm:$0xff]  ;;  %v32_v10 = vld [vmem:[%s382_s0] sm:$0xff]  ;;  %v40_v11 = vld [vmem:[#allocation2 + $0x30] sm:$0xff]  ;;  %p286_p9 = scmp.lt.s32.totalorder %s156_s12, %s156_s12 }
  0x16   :  { %222 = vmatprep.subr.bf16.mxu0 %v221_v4  ;;  %v229_v9 = vpack.c.bf16 %v39_v8, %v38_v7  ;;  %v41_v12 = vld [vmem:[#allocation2 + $0x38] sm:$0xff]  ;;  %218 = vmatprep.mubr.f32.mxu0 %v32_v10  ;;  %v134_v13 = vld [vmem:[%s385_s3] sm:$0xff]  ;;  %v135_v14 = vld [vmem:[%s385_s3 + $0x8] sm:$0xff] }
  0x17   :  { %224 = vmatpush3.bf16.msra.mxu0 %v221_v4  ;;  %138 = vperm.xlu0 %258, %v134_v13   ;;  %v233_v15 = vpack.c.bf16 %v41_v12, %v40_v11  ;;  %v42_v16 = vld [vmem:[#allocation2 + $0x40] sm:$0xff]  ;;  %v43_v17 = vld [vmem:[#allocation2 + $0x48] sm:$0xff]  ;;  %v44_v19 = vld [vmem:[#allocation2 + $0x50] sm:$0xff] }
  0x18   :  { %226 = vmatprep.subr.bf16.mxu0 %v225_v6  ;;  %v237_v18 = vpack.c.bf16 %v43_v17, %v42_v16  ;;  %v45_v20 = vld [vmem:[#allocation2 + $0x58] sm:$0xff]  ;;  %v46_v22 = vld [vmem:[#allocation2 + $0x60] sm:$0xff]  ;;  %v47_v23 = vld [vmem:[#allocation2 + $0x68] sm:$0xff] }
  0x19   :  { %v241_v21 = vpack.c.bf16 %v45_v20, %v44_v19  ;;  %v245_v24 = vpack.c.bf16 %v47_v23, %v46_v22  ;;  %v48_v25 = vld [vmem:[#allocation2 + $0x70] sm:$0xff]  ;;  %v49_v26 = vld [vmem:[#allocation2 + $0x78] sm:$0xff]  ;;  %v33_v28 = vld [vmem:[%s382_s0 + $0x8] sm:$0xff]  ;;  %s281_s0 = scalar_lea.vmem %s156_s12, 256 }
  0x1a   :  { %v249_v27 = vpack.c.bf16 %v49_v26, %v48_v25  ;;  %v167_v30 = vld [vmem:[%s384_s2] ss:$0 sm:$0xff]  ;;  %p282_p8 = scmp.ne.s32.totalorder %s156_s12, %s281_s0  ;;  %p287_p10 = scmp.lt.s32.totalorder %s281_s0, %s281_s0 }
  0x1b   :  { %228 = vmatpush3.bf16.msra.mxu0 %v225_v6  ;;  %143 = vperm.xlu0 %258, %v135_v14  }
  0x1c   :  { %230 = vmatprep.subr.bf16.mxu0 %v229_v9  ;;  %p288_p11 = por %p287_p10, %p286_p9 }
  0x1e   :  { %p289_p12 = pnand %p288_p11, %p282_p8 }
  0x1f   :  { %232 = vmatpush3.bf16.msra.mxu0 %v229_v9 }
  0x20   :  { %234 = vmatprep.subr.bf16.mxu0 %v233_v15 }
  0x23   :  { %236 = vmatpush3.bf16.msra.mxu0 %v233_v15 }
  0x24   :  { %238 = vmatprep.subr.bf16.mxu0 %v237_v18 }
  0x27   :  { %240 = vmatpush3.bf16.msra.mxu0 %v237_v18 }
  0x28   :  { %242 = vmatprep.subr.bf16.mxu0 %v241_v21 }
  0x2b   :  { %244 = vmatpush3.bf16.msra.mxu0 %v241_v21 }
  0x2c   :  { %246 = vmatprep.subr.bf16.mxu0 %v245_v24 }
  0x2f   :  { %248 = vmatpush3.bf16.msra.mxu0 %v245_v24 }
  0x30   :  { %250 = vmatprep.subr.bf16.mxu0 %v249_v27 }
  0x33   :  { %252 = vmatpush3.bf16.msra.mxu0 %v249_v27 }
  0x36   :  { %219 = vmatmul.mubr.f32.vlgmr.msra.gmra.mrb[0].mxu0 %v33_v28 }
  0x96   :  { %v139_v29 = vpop.permute.xlu0 %138 }
  0x9a   :  { %v144_v36 = vpop.permute.xlu0 %143 }
 0x109   :  { %v220_v31 = vpop.f32.mrb[0].mxu0 }
 0x10a   :  { %v129_v32 = vadd.f32 %v220_v31, %v167_v30  ;;  %v123_v33 = vpop.f32.mrb[1].mxu0 }
 0x10b   :  { %v124_v34 = vadd.f32 %v167_v30, %v123_v33 }
 0x10c   :  { %v133_v35 = vmax.f32 %v129_v32, 0.0 }
 0x10d   :  { %v132_v37 = vmax.f32 %v124_v34, 0.0 }
 0x10e   :  { %v147_v38 = vmul.f32 %v144_v36, %v133_v35 }
 0x10f   :  { %v146_v39 = vmul.f32 %v139_v29, %v132_v37 }
 0x110   :  { %149 = vst [vmem:[#allocation5 + $0x8] sm:$0xff] %v147_v38 }
 0x111   :  { %148 = vst [vmem:[#allocation5] sm:$0xff] %v146_v39 }
 0x112   :  { %292 = shalt.err (!%p289_p12)
}
 0x113   :  { %s293_s14 = scalar_lea.hbm %s386_s4, 256 }
 0x114   :  { %p294_p13 = scmp.ne.s32.totalorder %s386_s4, %s293_s14  ;;  %p297_p0 = scmp.lt.u32.totalorder %s293_s14, %s386_s4 }
 0x116   :  { %p299_p1 = pnand %p297_p0, %p294_p13 }
 0x118   :  { %302 = shalt.err (!%p299_p1)
}
 0x119   :  { %161 = dma.vmem_to_hbm [thread:$0]  %s156_s12, 256, %s386_s4, [#allocation4], %s308_s25, %s308_s25, %s309_s26  }
 0x11a   :  { %305 = dma.done.wait [#allocation4], 256  }
 0x11b   :  { %306 = vsyncadd [#allocation4], 4294967040 }
 0x11c   :  { %165 = vsyncpa [#allocation3], 1 }
 0x11d   :  { %166 = vsyncpa [#allocation4], 1 }

</bundles_post_ra>
